<compile_context>
chip_gen: v7x
topology: tpu7x:2x2x1
jax: 0.10.0
libtpu: 0.0.40
codegen_flags: <defaults>
</compile_context>

<pallas_src>
import jax
import jax.numpy as jnp
from jax.experimental import pallas as pl
from jax.experimental.pallas import tpu as pltpu


def _normalize_kernel(x_ref, scale_ref, bias_ref, o_ref):
    # x_ref/o_ref: (tr, tc); scale/bias: (tr, 1) or (1, tc) f32, VPU broadcast.
    x = x_ref[...].astype(jnp.float32)
    o_ref[...] = (x * scale_ref[...] + bias_ref[...]).astype(o_ref.dtype)


def _chip_defaults():
    """Per-generation (tile_target_bytes, vmem_limit_bytes, multi_tensorcore)."""
    try:
        kind = jax.devices()[0].device_kind.lower()
    except Exception:
        kind = ""
    if "v7" in kind:
        # ~3.2 TB/s HBM per TC: bigger tiles amortize the ~0.35 us per-step
        # overhead; 8 MiB x {in,out} x 2 buffers = 32 MiB, < 48 MiB scoped.
        return 8 * 1024 * 1024, 48 * 1024 * 1024, True
    # v5e/v6e: roofline flat past ~1-2 MiB tiles; keep VMEM pressure modest.
    return 2 * 1024 * 1024, 32 * 1024 * 1024, False


def _pick_tiles(R, L, itemsize, target_bytes):
    """Pick (tr, tc) for a (R, L) elementwise stream.

    Prefer tc == L (each block = one contiguous HBM burst). Only cap columns
    when even an 8-row full-width slab blows the byte budget, and then pick a
    lane-dense (multiple of 128) tc that divides L to avoid ragged/masked
    last-column blocks.
    """
    min_rows = min(R, 8)
    if L * min_rows * itemsize <= target_bytes:
        tc = L
    else:
        cap = max(128, (target_bytes // (min_rows * itemsize)) // 128 * 128)
        tc = None
        c = min(cap, (L // 128) * 128)
        while c >= 128:
            if L % c == 0:
                tc = c
                break
            c -= 128
        if tc is None:
            tc = cap  # ragged tail unavoidable; still lane-dense (mult. of 128)
    rows = max(1, target_bytes // (tc * itemsize))
    if rows >= R or R <= 8:
        tr = R                      # full extent (always a legal block)
    else:
        tr = min(R, max(8, (rows // 8) * 8))   # sublane-aligned slab
    return tr, tc


def normalize_by_channel_mean_std(x, mean, std, *, min_pallas_bytes=2 * 1024 * 1024):
    """(x - mean[None,:,None,None]) / std[None,:,None,None] for NCHW x."""
    N, C, H, W = x.shape
    mean32 = jnp.asarray(mean, dtype=jnp.float32)
    std32 = jnp.asarray(std, dtype=jnp.float32)
    assert mean32.shape == (C,) and std32.shape == (C,), (
        f"mean/std must have {C} channels, got {mean32.shape}/{std32.shape}")

    # Tiny tensors: a fused XLA broadcast beats any pallas_call launch.
    if x.size * x.dtype.itemsize < min_pallas_bytes:
        out = (x - mean32[None, :, None, None]) / std32[None, :, None, None]
        return out.astype(x.dtype)

    # Affine form in f32: x * (1/std) + (-mean/std); no vector divide in-loop.
    scale = 1.0 / std32
    bias = -mean32 * scale

    target_bytes, vmem_limit, multi_tc = _chip_defaults()
    itemsize = x.dtype.itemsize
    HW = H * W

    # Layout dispatch (see module docstring).
    row_layout = (HW >= 128) and (HW % 128 == 0) and (N * C >= 8)
    if row_layout:
        R, L = N * C, HW
        x2 = x.reshape(R, L)                       # free for contiguous NCHW
        scale2 = jnp.tile(scale, N).reshape(R, 1)  # row r -> channel r % C
        bias2 = jnp.tile(bias, N).reshape(R, 1)
    else:
        R, L = N, C * HW
        x2 = x.reshape(R, L)
        scale2 = jnp.repeat(scale, HW).reshape(1, L)  # lane -> its channel
        bias2 = jnp.repeat(bias, HW).reshape(1, L)

    tr, tc = _pick_tiles(R, L, itemsize, target_bytes)
    # Column axis innermost: scale/bias block index is constant across it, so
    # their DMA is hoisted out of the inner loop.  Do not reorder the grid.
    grid = (pl.cdiv(R, tr), pl.cdiv(L, tc))

    if row_layout:
        const_spec = pl.BlockSpec((tr, 1), lambda i, j: (i, 0))
    else:
        const_spec = pl.BlockSpec((1, tc), lambda i, j: (0, j))

    # Explicit dual-TensorCore split on v7x; 1-TC chips use plain "parallel".
    if multi_tc and grid[0] >= 2:
        dim_sem = (pltpu.CORE_PARALLEL, pltpu.ARBITRARY)
    else:
        dim_sem = ("parallel", "parallel")

    out2 = pl.pallas_call(
        _normalize_kernel,
        out_shape=jax.ShapeDtypeStruct((R, L), x.dtype),
        grid=grid,
        in_specs=[
            pl.BlockSpec((tr, tc), lambda i, j: (i, j)),   # x tile
            const_spec,                                    # scale (f32)
            const_spec,                                    # bias (f32)
        ],
        out_specs=pl.BlockSpec((tr, tc), lambda i, j: (i, j)),
        compiler_params=pltpu.CompilerParams(
            dimension_semantics=dim_sem,
            vmem_limit_bytes=vmem_limit,
        ),
    )(x2, scale2, bias2)

    return out2.reshape(N, C, H, W)


if __name__ == "__main__":
    key = jax.random.PRNGKey(0)
    k1, k2 = jax.random.split(key)

    # Deterministic "buffer" initialization (mimics module __init__ args).
    mean = jnp.array([0.485, 0.456, 0.406, 0.5], dtype=jnp.float32)
    std = jnp.array([0.229, 0.224, 0.225, 0.25], dtype=jnp.float32)

    # Case 1: 128-aligned plane -> (N*C, H*W) row layout.
    x1 = jax.random.normal(k1, (2, 4, 16, 16), dtype=jnp.float32)
    out1 = jax.block_until_ready(
        normalize_by_channel_mean_std(x1, mean, std, min_pallas_bytes=0))
    ref1 = (x1 - mean[None, :, None, None]) / std[None, :, None, None]
    assert jnp.allclose(out1, ref1, atol=1e-5, rtol=1e-5)

    # Case 2: small plane (H*W = 64 < 128) -> (N, C*H*W) lane layout.
    x2 = jax.random.normal(k2, (2, 4, 8, 8), dtype=jnp.float32)
    out2 = jax.block_until_ready(
        normalize_by_channel_mean_std(x2, mean, std, min_pallas_bytes=0))
    ref2 = (x2 - mean[None, :, None, None]) / std[None, :, None, None]
    assert jnp.allclose(out2, ref2, atol=1e-5, rtol=1e-5)

    print("KERNEL_OK")
</pallas_src>

<mosaic_0001>
module attributes {stable_mosaic.version = 11 : i64} {
  func.func @_normalize_kernel(%arg0: i32, %arg1: i32, %arg2: memref<8x256xf32, #tpu.memory_space<vmem>>, %arg3: memref<8x1xf32, #tpu.memory_space<vmem>>, %arg4: memref<8x1xf32, #tpu.memory_space<vmem>>, %arg5: memref<8x256xf32, #tpu.memory_space<vmem>>) attributes {dimension_semantics = [#tpu.dimension_semantics<parallel>, #tpu.dimension_semantics<parallel>], iteration_bounds = array<i64: 1, 1>, scalar_prefetch = 0 : i64, scratch_operands = 0 : i64, tpu.core_type = #tpu.core_type<tc>, window_params = [{transform_indices = @transform_0, window_bounds = array<i64: 8, 256>}, {transform_indices = @transform_1, window_bounds = array<i64: 8, 1>}, {transform_indices = @transform_2, window_bounds = array<i64: 8, 1>}, {transform_indices = @transform_3, window_bounds = array<i64: 8, 256>}]} {
    %c0 = arith.constant 0 : index
    %c0_0 = arith.constant 0 : index
    %0 = vector.load %arg2[%c0, %c0_0] : memref<8x256xf32, #tpu.memory_space<vmem>>, vector<8x256xf32>
    %c0_1 = arith.constant 0 : index
    %c0_2 = arith.constant 0 : index
    %1 = vector.load %arg3[%c0_1, %c0_2] : memref<8x1xf32, #tpu.memory_space<vmem>>, vector<8x1xf32>
    %2 = vector.broadcast %1 : vector<8x1xf32> to vector<8x256xf32>
    %3 = arith.mulf %0, %2 : vector<8x256xf32>
    %c0_3 = arith.constant 0 : index
    %c0_4 = arith.constant 0 : index
    %4 = vector.load %arg4[%c0_3, %c0_4] : memref<8x1xf32, #tpu.memory_space<vmem>>, vector<8x1xf32>
    %5 = vector.broadcast %4 : vector<8x1xf32> to vector<8x256xf32>
    %6 = arith.addf %3, %5 : vector<8x256xf32>
    %c0_5 = arith.constant 0 : index
    %c0_6 = arith.constant 0 : index
    %7 = vector.load %arg5[%c0_5, %c0_6] : memref<8x256xf32, #tpu.memory_space<vmem>>, vector<8x256xf32>
    tpu.vector_store %arg5[%c0_5, %c0_6], %6 {strides = array<i32>} : memref<8x256xf32, #tpu.memory_space<vmem>>, vector<8x256xf32>,
    return
  }
  func.func @transform_0(%arg0: i32, %arg1: i32) -> (i32, i32) {
    %c0_i32 = arith.constant 0 : i32
    return %arg0, %arg1 : i32, i32
  }
  func.func @transform_1(%arg0: i32, %arg1: i32) -> (i32, i32) {
    %c0_i32 = arith.constant 0 : i32
    %c0_i32_0 = arith.constant 0 : i32
    return %arg0, %c0_i32 : i32, i32
  }
  func.func @transform_2(%arg0: i32, %arg1: i32) -> (i32, i32) {
    %c0_i32 = arith.constant 0 : i32
    %c0_i32_0 = arith.constant 0 : i32
    return %arg0, %c0_i32 : i32, i32
  }
  func.func @transform_3(%arg0: i32, %arg1: i32) -> (i32, i32) {
    %c0_i32 = arith.constant 0 : i32
    return %arg0, %arg1 : i32, i32
  }
}

</mosaic_0001>

<bundles_post_ra>
// kernel: tpu_custom_call.1
= control target key start
LH: loop header
LB: loop body
LE: loop exit
PB: predicated region body
PF: predicated region fallthrough
CT: control target
= control target key end

     0   :  { %s122_s0 = inlined_call_operand.vmem [shape: f32[8,256], index: 0, kind: input, shape index: {}]   ;;  %s123_s1 = inlined_call_operand.vmem [shape: f32[8,1], index: 1, kind: input, shape index: {}]   ;;  %s124_s2 = inlined_call_operand.vmem [shape: f32[8,1], index: 2, kind: input, shape index: {}]   ;;  %s125_s3 = inlined_call_operand.hbm [shape: f32[8,256], index: 3, kind: output, shape index: {}]  }
   0x1   :  { %v17_v0 = vld [vmem:[%s123_s1] sm:$0xff] }
   0x2   :  { %8 = vsyncpa [#allocation3], 0  ;;  %v76_v1 = vmov 0   ;;  %v25_v2 = vld [vmem:[%s124_s2] sm:$0xff]  ;;  %v16_v5 = vld [vmem:[%s122_s0 + $0x8] sm:$0xff]  ;;  %s77_s20 = smov [#allocation2]  }
   0x3   :  { %51 = vset.pattern.permute.xlu0 %v76_v1  ;;  %v15_v4 = vld [vmem:[%s122_s0] sm:$0xff]  ;;  %s41_s1 = sshll.u32 %s77_s20, 4  ;;  %s42_s1 = int_to_ptr.vmem [resolvable:$true] %s41_s1 }
   0x4   :  { %20 = vperm.xlu0 %51, %v17_v0   ;;  %s52_s2 = scalar_lea.vmem %s42_s1, 256  ;;  %p57_p1 = scmp.lt.s32.totalorder %s42_s1, %s42_s1 }
   0x5   :  { %p53_p0 = scmp.ne.s32.totalorder %s42_s1, %s52_s2  ;;  %p58_p2 = scmp.lt.s32.totalorder %s52_s2, %s52_s2 }
   0x7   :  { %p59_p3 = por %p58_p2, %p57_p1 }
   0x8   :  { %28 = vperm.xlu0 %51, %v25_v2  }
   0x9   :  { %p60_p4 = pnand %p59_p3, %p53_p0 }
  0x83   :  { %v21_v3 = vpop.permute.xlu0 %20 }
  0x84   :  { %v23_v6 = vmul.f32 %v21_v3, %v15_v4  ;;  %v24_v7 = vmul.f32 %v21_v3, %v16_v5 }
  0x87   :  { %v29_v8 = vpop.permute.xlu0 %28 }
  0x88   :  { %v31_v9 = vadd.f32 %v29_v8, %v23_v6  ;;  %v32_v10 = vadd.f32 %v29_v8, %v24_v7 }
  0x8a   :  { %33 = vst [vmem:[#allocation2] sm:$0xff] %v31_v9  ;;  %34 = vst [vmem:[#allocation2 + $0x8] sm:$0xff] %v32_v10 }
  0x8b   :  { %63 = shalt.err (!%p60_p4)
}
  0x8c   :  { %s64_s0 = scalar_lea.hbm %s125_s3, 256 }
  0x8d   :  { %p65_p5 = scmp.ne.s32.totalorder %s125_s3, %s64_s0  ;;  %p68_p6 = scmp.lt.u32.totalorder %s64_s0, %s125_s3 }
  0x8f   :  { %p70_p7 = pnand %p68_p6, %p65_p5 }
  0x91   :  { %73 = shalt.err (!%p70_p7)
}
  0x92   :  { %44 = dma.vmem_to_hbm [thread:$0]  %s42_s1, 256, %s125_s3, [#allocation3]  }
  0x93   :  { %74 = dma.done.wait [#allocation3], 256  }
  0x94   :  { %75 = vsyncadd [#allocation3], 4294967040 }
  0x95   :  { %48 = vsyncpa [#allocation3], 1 }

</bundles_post_ra>
